<compile_context>
chip_gen: v6e
topology: v6e:2x2x1
jax: 0.10.0
libtpu: 0.0.40
codegen_flags: <defaults>
</compile_context>

<pallas_src>
import jax
import jax.numpy as jnp
from jax import lax
from jax.experimental import pallas as pl
from jax.experimental.pallas import tpu as pltpu

EPS = 1e-5


def _vmem():
    return pl.BlockSpec(memory_space=pltpu.MemorySpace.VMEM)


def _smem():
    return pl.BlockSpec(memory_space=pltpu.MemorySpace.SMEM)


# ----------------------------------------------------------------------------
# Fused value-head kernel (single grid point; everything fits in VMEM).
# ----------------------------------------------------------------------------
def value_head_kernel(x_ref, wblk_ref, bc_ref, g_ref, be_ref,
                      w1_ref, b1_ref, w2_ref, b2_ref, out_ref):
    N = out_ref.shape[0]
    HW = w1_ref.shape[0]
    inv_cnt = 1.0 / float(N * HW)

    # 1x1 conv (C -> 1 channel) as one lane-dense MXU dot:
    #   (N, N*C) @ (N*C, HW) -> (N, HW), bf16 operands, f32 accumulation.
    # Output is already in the (N, boardSize**2) orientation the flatten expects.
    y = jnp.dot(wblk_ref[...], x_ref[...],
                preferred_element_type=jnp.float32) + bc_ref[0]          # (N, HW) f32

    # BatchNorm2d(1) training-mode batch stats + ReLU, folded to a scalar scale/shift.
    # Single pass over y: sum and sum-of-squares; biased variance matches PyTorch forward.
    s1 = jnp.sum(y)
    s2 = jnp.sum(y * y)
    m = s1 * inv_cnt
    var = s2 * inv_cnt - m * m
    scale = g_ref[0] * lax.rsqrt(var + EPS)
    shift = be_ref[0] - m * scale
    h = jnp.maximum(y * scale + shift, 0.0)                              # (N, HW) f32

    # fc1 + ReLU (MXU dot, bf16 operands, f32 accumulation).
    h1 = jnp.maximum(
        jnp.dot(h.astype(w1_ref.dtype), w1_ref[...],
                preferred_element_type=jnp.float32) + b1_ref[...], 0.0)  # (N, 256) f32

    # fc2 (256 -> 1) + tanh: VPU multiply + lane reduction (a 1-column MXU dot would waste
    # the array).  tanh goes to the EUP.
    logits = jnp.sum(h1 * w2_ref[...], axis=-1, keepdims=True) + b2_ref[0]   # (N, 1) f32
    out_ref[...] = jnp.tanh(logits)


# ----------------------------------------------------------------------------
# Wrapper
# ----------------------------------------------------------------------------
def value_head_forward(params, x_nchw):
    N, C, H, W = x_nchw.shape
    HW = H * W

    # NCHW -> (N*C, HW): a free, contiguous reshape — no transpose, no extra HBM relayout.
    # bf16 cast for the MXU operands (in a full network this cast fuses with the trunk).
    x_flat = x_nchw.reshape(N * C, HW).astype(jnp.bfloat16)

    # Block-diagonal 1x1-conv weight: row n carries wc on the channel slots of batch
    # element n, so the conv becomes a single (N, N*C) @ (N*C, HW) matmul producing (N, HW).
    w_blk = (jnp.eye(N, dtype=jnp.float32)[:, :, None]
             * params["wc"][None, None, :]).reshape(N, N * C).astype(jnp.bfloat16)

    return pl.pallas_call(
        value_head_kernel,
        out_shape=jax.ShapeDtypeStruct((N, 1), jnp.float32),
        in_specs=[_vmem(),    # x_flat (N*C, HW)  bf16
                  _vmem(),    # w_blk  (N, N*C)   bf16
                  _smem(),    # bc     (1,)       f32
                  _smem(),    # gamma  (1,)       f32
                  _smem(),    # beta   (1,)       f32
                  _vmem(),    # w1     (HW, 256)  bf16
                  _vmem(),    # b1     (1, 256)   f32
                  _vmem(),    # w2     (1, 256)   f32
                  _smem()],   # b2     (1,)       f32
        out_specs=_vmem(),
        compiler_params=pltpu.CompilerParams(vmem_limit_bytes=32 * 1024 * 1024),
    )(x_flat, w_blk, params["bc"], params["gamma"], params["beta"],
      params["w1"].astype(jnp.bfloat16), params["b1"], params["w2"], params["b2"])


# ----------------------------------------------------------------------------
# Pure-JAX reference.  mxu_dtype=jnp.bfloat16 mirrors the kernel's MXU operand precision
# (f32 accumulation); mxu_dtype=jnp.float32 is the full-precision PyTorch math.
# ----------------------------------------------------------------------------
def value_head_ref(params, x_nchw, mxu_dtype=jnp.float32):
    N, C, H, W = x_nchw.shape
    HW = H * W
    f32 = jnp.float32
    x = x_nchw.astype(mxu_dtype).astype(f32)
    wc = params["wc"].astype(mxu_dtype).astype(f32)
    y = jnp.einsum("nchw,c->nhw", x, wc).reshape(N, HW) + params["bc"][0]
    m = jnp.mean(y)
    v = jnp.mean(y * y) - m * m
    h = jnp.maximum((y - m) * lax.rsqrt(v + EPS) * params["gamma"][0] + params["beta"][0], 0.0)
    h1 = jnp.maximum(h.astype(mxu_dtype).astype(f32)
                     @ params["w1"].astype(mxu_dtype).astype(f32) + params["b1"], 0.0)
    return jnp.tanh(jnp.sum(h1 * params["w2"], axis=-1, keepdims=True) + params["b2"][0])


# ----------------------------------------------------------------------------
# Deterministic synthetic parameters
# ----------------------------------------------------------------------------
def init_params(key, inputC, boardSize):
    HW = boardSize * boardSize
    keys = iter(jax.random.split(key, 16))

    def nrm(shape, scale):
        return (scale * jax.random.normal(next(keys), shape)).astype(jnp.float32)

    return dict(
        wc=nrm((inputC,), 0.1), bc=nrm((1,), 0.05),
        gamma=1.0 + nrm((1,), 0.05), beta=nrm((1,), 0.05),
        w1=nrm((HW, 256), 0.05), b1=nrm((1, 256), 0.05),
        w2=nrm((1, 256), 0.05), b2=nrm((1,), 0.05),
    )


if __name__ == "__main__":
    inputC, boardSize, N = 32, 16, 8

    key = jax.random.PRNGKey(0)
    pkey, xkey = jax.random.split(key)
    params = init_params(pkey, inputC, boardSize)
    x = jax.random.normal(xkey, (N, inputC, boardSize, boardSize), dtype=jnp.float32)

    fwd = jax.jit(value_head_forward)
    out = fwd(params, x)
    jax.block_until_ready(out)

    ref_mixed = value_head_ref(params, x, mxu_dtype=jnp.bfloat16)   # mirrors kernel precision
    ref_f32 = value_head_ref(params, x, mxu_dtype=jnp.float32)      # full-f32 PyTorch math

    assert out.shape == (N, 1), out.shape
    assert bool(jnp.all(jnp.isfinite(out)))
    assert bool(jnp.all(jnp.abs(out) <= 1.0))
    assert bool(jnp.allclose(out, ref_mixed, atol=2e-3, rtol=2e-2)), (out, ref_mixed)
    assert bool(jnp.allclose(out, ref_f32, atol=8e-2, rtol=1e-1)), (out, ref_f32)
    print("KERNEL_OK")
</pallas_src>

<mosaic_0001>
module attributes {stable_mosaic.version = 11 : i64} {
  func.func @value_head_kernel(%arg0: memref<256x256xbf16, #tpu.memory_space<vmem>>, %arg1: memref<8x256xbf16, #tpu.memory_space<vmem>>, %arg2: memref<1xf32, #tpu.memory_space<smem>>, %arg3: memref<1xf32, #tpu.memory_space<smem>>, %arg4: memref<1xf32, #tpu.memory_space<smem>>, %arg5: memref<256x256xbf16, #tpu.memory_space<vmem>>, %arg6: memref<1x256xf32, #tpu.memory_space<vmem>>, %arg7: memref<1x256xf32, #tpu.memory_space<vmem>>, %arg8: memref<1xf32, #tpu.memory_space<smem>>, %arg9: memref<8x1xf32, #tpu.memory_space<vmem>>) attributes {dimension_semantics = [], scalar_prefetch = 0 : i64, scratch_operands = 0 : i64, tpu.core_type = #tpu.core_type<tc>} {
    %c0 = arith.constant 0 : index
    %c0_0 = arith.constant 0 : index
    %0 = vector.load %arg1[%c0, %c0_0] : memref<8x256xbf16, #tpu.memory_space<vmem>>, vector<8x256xbf16>
    %c0_1 = arith.constant 0 : index
    %c0_2 = arith.constant 0 : index
    %1 = vector.load %arg0[%c0_1, %c0_2] : memref<256x256xbf16, #tpu.memory_space<vmem>>, vector<256x256xbf16>
    %cst = arith.constant dense<0.000000e+00> : vector<8x256xf32>
    %2 = tpu.matmul %0, %1, %cst {dimension_numbers = #tpu.dot_dimension_numbers<[1], [0], [0], [1], [0, 0, 1, 1], [], []>} : vector<8x256xbf16>, vector<256x256xbf16>, vector<8x256xf32> -> vector<8x256xf32>
    %c0_3 = arith.constant 0 : index
    %3 = memref.load %arg2[%c0_3] : memref<1xf32, #tpu.memory_space<smem>>
    %4 = vector.broadcast %3 : f32 to vector<8x256xf32>
    %5 = arith.addf %2, %4 : vector<8x256xf32>
    %6 = vector.shape_cast %5 : vector<8x256xf32> to vector<1x8x256xf32>
    %cst_4 = arith.constant dense<0.000000e+00> : vector<1xf32>
    %7 = vector.multi_reduction <add>, %6, %cst_4 [1, 2] : vector<1x8x256xf32> to vector<1xf32>
    %8 = vector.shape_cast %7 : vector<1xf32> to vector<1x1x1xf32>
    %9 = vector.extract %8[0, 0, 0] : f32 from vector<1x1x1xf32>
    %10 = arith.mulf %5, %5 : vector<8x256xf32>
    %11 = vector.shape_cast %10 : vector<8x256xf32> to vector<1x8x256xf32>
    %cst_5 = arith.constant dense<0.000000e+00> : vector<1xf32>
    %12 = vector.multi_reduction <add>, %11, %cst_5 [1, 2] : vector<1x8x256xf32> to vector<1xf32>
    %13 = vector.shape_cast %12 : vector<1xf32> to vector<1x1x1xf32>
    %14 = vector.extract %13[0, 0, 0] : f32 from vector<1x1x1xf32>
    %cst_6 = arith.constant 4.8828125E-4 : f32
    %15 = arith.mulf %9, %cst_6 : f32
    %cst_7 = arith.constant 4.8828125E-4 : f32
    %16 = arith.mulf %14, %cst_7 : f32
    %17 = arith.mulf %15, %15 : f32
    %18 = arith.subf %16, %17 : f32
    %c0_8 = arith.constant 0 : index
    %19 = memref.load %arg3[%c0_8] : memref<1xf32, #tpu.memory_space<smem>>
    %cst_9 = arith.constant 9.99999974E-6 : f32
    %20 = arith.addf %18, %cst_9 : f32
    %21 = math.rsqrt %20 : f32
    %22 = arith.mulf %19, %21 : f32
    %c0_10 = arith.constant 0 : index
    %23 = memref.load %arg4[%c0_10] : memref<1xf32, #tpu.memory_space<smem>>
    %24 = arith.mulf %15, %22 : f32
    %25 = arith.subf %23, %24 : f32
    %26 = vector.broadcast %22 : f32 to vector<8x256xf32>
    %27 = arith.mulf %5, %26 : vector<8x256xf32>
    %28 = vector.broadcast %25 : f32 to vector<8x256xf32>
    %29 = arith.addf %27, %28 : vector<8x256xf32>
    %cst_11 = arith.constant 0.000000e+00 : f32
    %30 = vector.broadcast %cst_11 : f32 to vector<8x256xf32>
    %31 = arith.maximumf %29, %30 : vector<8x256xf32>
    %32 = arith.truncf %31 : vector<8x256xf32> to vector<8x256xbf16>
    %c0_12 = arith.constant 0 : index
    %c0_13 = arith.constant 0 : index
    %33 = vector.load %arg5[%c0_12, %c0_13] : memref<256x256xbf16, #tpu.memory_space<vmem>>, vector<256x256xbf16>
    %cst_14 = arith.constant dense<0.000000e+00> : vector<8x256xf32>
    %34 = tpu.matmul %32, %33, %cst_14 {dimension_numbers = #tpu.dot_dimension_numbers<[1], [0], [0], [1], [0, 0, 1, 1], [], []>} : vector<8x256xbf16>, vector<256x256xbf16>, vector<8x256xf32> -> vector<8x256xf32>
    %c0_15 = arith.constant 0 : index
    %c0_16 = arith.constant 0 : index
    %35 = vector.load %arg6[%c0_15, %c0_16] : memref<1x256xf32, #tpu.memory_space<vmem>>, vector<1x256xf32>
    %36 = vector.broadcast %35 : vector<1x256xf32> to vector<8x256xf32>
    %37 = arith.addf %34, %36 : vector<8x256xf32>
    %cst_17 = arith.constant 0.000000e+00 : f32
    %38 = vector.broadcast %cst_17 : f32 to vector<8x256xf32>
    %39 = arith.maximumf %37, %38 : vector<8x256xf32>
    %c0_18 = arith.constant 0 : index
    %c0_19 = arith.constant 0 : index
    %40 = vector.load %arg7[%c0_18, %c0_19] : memref<1x256xf32, #tpu.memory_space<vmem>>, vector<1x256xf32>
    %41 = vector.broadcast %40 : vector<1x256xf32> to vector<8x256xf32>
    %42 = arith.mulf %39, %41 : vector<8x256xf32>
    %cst_20 = arith.constant dense<0.000000e+00> : vector<8xf32>
    %43 = vector.multi_reduction <add>, %42, %cst_20 [1] : vector<8x256xf32> to vector<8xf32>
    %44 = vector.shape_cast %43 : vector<8xf32> to vector<8x1xf32>
    %c0_21 = arith.constant 0 : index
    %45 = memref.load %arg8[%c0_21] : memref<1xf32, #tpu.memory_space<smem>>
    %46 = vector.broadcast %45 : f32 to vector<8x1xf32>
    %47 = arith.addf %44, %46 : vector<8x1xf32>
    %48 = math.tanh %47 : vector<8x1xf32>
    %c0_22 = arith.constant 0 : index
    %c0_23 = arith.constant 0 : index
    %49 = vector.load %arg9[%c0_22, %c0_23] : memref<8x1xf32, #tpu.memory_space<vmem>>, vector<8x1xf32>
    tpu.vector_store %arg9[%c0_22, %c0_23], %48 {strides = array<i32>} : memref<8x1xf32, #tpu.memory_space<vmem>>, vector<8x1xf32>,
    return
  }
}

</mosaic_0001>

<bundles_post_ra>
// kernel: value_head_forward.1
= control target key start
LH: loop header
LB: loop body
LE: loop exit
PB: predicated region body
PF: predicated region fallthrough
CT: control target
= control target key end

     0   :  { %vm592_vm0 = vcmask 7168   ;;  %s1050_s0 = inlined_call_operand.vmem [shape: bf16[256,256], index: 0, kind: input, shape index: {}]   ;;  %s1051_s1 = inlined_call_operand.vmem [shape: bf16[8,256], index: 1, kind: input, shape index: {}]   ;;  %s1052_s2 = inlined_call_operand.<no memory space> [shape: f32[1], index: 2, kind: input, shape index: {}]   ;;  %s1053_s5 = inlined_call_operand.vmem [shape: bf16[256,256], index: 5, kind: input, shape index: {}]   ;;  %s1054_s3 = inlined_call_operand.<no memory space> [shape: f32[1], index: 3, kind: input, shape index: {}]   ;;  %s1055_s4 = inlined_call_operand.<no memory space> [shape: f32[1], index: 4, kind: input, shape index: {}]   ;;  %s1056_s6 = inlined_call_operand.vmem [shape: f32[1,256], index: 6, kind: input, shape index: {}]   ;;  %s1057_s7 = inlined_call_operand.vmem [shape: f32[1,256], index: 7, kind: input, shape index: {}]   ;;  %s1058_s8 = inlined_call_operand.<no memory space> [shape: f32[1], index: 8, kind: input, shape index: {}]   ;;  %s1059_s9 = inlined_call_operand.vmem [shape: f32[8,1], index: 9, kind: output, shape index: {}]  }
   0x1   :  { %v670_v0 = vld [vmem:[%s1050_s0 + $0x74] ss:$8 sps:$4 sm:$0xff]   ;;  %v672_v1 = vld [vmem:[%s1050_s0 + $0x70] ss:$8 sps:$4 sm:$0xff]   ;;  %v673_v2 = vld [vmem:[%s1050_s0 + $0x64] ss:$8 sps:$4 sm:$0xff]   ;;  %v70_v35 = vstv %s1052_s2 }
   0x2   :  { %238 = vmatprep.subr.bf16.mxu0 %v670_v0  ;;  %v675_v3 = vld [vmem:[%s1050_s0 + $0x60] ss:$8 sps:$4 sm:$0xff]   ;;  %v676_v4 = vld [vmem:[%s1050_s0 + $0x54] ss:$8 sps:$4 sm:$0xff]   ;;  %v678_v5 = vld [vmem:[%s1050_s0 + $0x50] ss:$8 sps:$4 sm:$0xff]  }
   0x3   :  { %239 = vmatpush1.bf16.msra.mxu0 %v672_v1  ;;  %v679_v6 = vld [vmem:[%s1050_s0 + $0x44] ss:$8 sps:$4 sm:$0xff]   ;;  %v681_v7 = vld [vmem:[%s1050_s0 + $0x40] ss:$8 sps:$4 sm:$0xff]   ;;  %v682_v8 = vld [vmem:[%s1050_s0 + $0x34] ss:$8 sps:$4 sm:$0xff]  }
   0x4   :  { %240 = vmatprep.subr.bf16.mxu0 %v673_v2  ;;  %v684_v9 = vld [vmem:[%s1050_s0 + $0x30] ss:$8 sps:$4 sm:$0xff]   ;;  %v685_v10 = vld [vmem:[%s1050_s0 + $0x24] ss:$8 sps:$4 sm:$0xff]   ;;  %v687_v11 = vld [vmem:[%s1050_s0 + $0x20] ss:$8 sps:$4 sm:$0xff]  }
   0x5   :  { %v688_v12 = vld [vmem:[%s1050_s0 + $0x14] ss:$8 sps:$4 sm:$0xff]   ;;  %v36_v13 = vld [vmem:[%s1051_s1] sm:$0xff]  ;;  %v690_v15 = vld [vmem:[%s1050_s0 + $0x10] ss:$8 sps:$4 sm:$0xff]  }
   0x6   :  { %v599_v14 = vcombine.high %v36_v13, %v36_v13  ;;  %v691_v16 = vld [vmem:[%s1050_s0 + $0x4] ss:$8 sps:$4 sm:$0xff]   ;;  %v693_v17 = vld [vmem:[%s1050_s0] ss:$8 sps:$4 sm:$0xff]   ;;  %v694_v18 = vld [vmem:[%s1050_s0 + $0xf4] ss:$8 sps:$4 sm:$0xff]   ;;  %v598_v34 = vcombine.low %v36_v13, %v36_v13 }
   0x7   :  { %241 = vmatpush1.bf16.msra.mxu0 %v675_v3  ;;  %v696_v19 = vld [vmem:[%s1050_s0 + $0xf0] ss:$8 sps:$4 sm:$0xff]   ;;  %v697_v20 = vld [vmem:[%s1050_s0 + $0xe4] ss:$8 sps:$4 sm:$0xff]   ;;  %v699_v21 = vld [vmem:[%s1050_s0 + $0xe0] ss:$8 sps:$4 sm:$0xff]  }
   0x8   :  { %242 = vmatprep.subr.bf16.mxu0 %v676_v4  ;;  %270 = vmatprep.mubr.bf16.mxu0 %v599_v14  ;;  %v700_v22 = vld [vmem:[%s1050_s0 + $0xd4] ss:$8 sps:$4 sm:$0xff]   ;;  %v702_v23 = vld [vmem:[%s1050_s0 + $0xd0] ss:$8 sps:$4 sm:$0xff]   ;;  %v703_v24 = vld [vmem:[%s1050_s0 + $0xc4] ss:$8 sps:$4 sm:$0xff]  }
   0x9   :  { %v705_v25 = vld [vmem:[%s1050_s0 + $0xc0] ss:$8 sps:$4 sm:$0xff]   ;;  %v706_v26 = vld [vmem:[%s1050_s0 + $0xb4] ss:$8 sps:$4 sm:$0xff]   ;;  %v708_v27 = vld [vmem:[%s1050_s0 + $0xb0] ss:$8 sps:$4 sm:$0xff]  }
   0xa   :  { %v709_v28 = vld [vmem:[%s1050_s0 + $0xa4] ss:$8 sps:$4 sm:$0xff]   ;;  %v711_v29 = vld [vmem:[%s1050_s0 + $0xa0] ss:$8 sps:$4 sm:$0xff]   ;;  %v712_v30 = vld [vmem:[%s1050_s0 + $0x94] ss:$8 sps:$4 sm:$0xff]  }
   0xb   :  { %243 = vmatpush1.bf16.msra.mxu0 %v678_v5  ;;  %v714_v31 = vld [vmem:[%s1050_s0 + $0x90] ss:$8 sps:$4 sm:$0xff]   ;;  %v715_v32 = vld [vmem:[%s1050_s0 + $0x84] ss:$8 sps:$4 sm:$0xff]   ;;  %v717_v33 = vld [vmem:[%s1050_s0 + $0x80] ss:$8 sps:$4 sm:$0xff]  }
   0xc   :  { %244 = vmatprep.subr.bf16.mxu0 %v679_v6  ;;  %v720_v46 = vld [vmem:[%s1053_s5 + $0x74] ss:$8 sps:$4 sm:$0xff]   ;;  %v722_v47 = vld [vmem:[%s1053_s5 + $0x70] ss:$8 sps:$4 sm:$0xff]   ;;  %v723_v48 = vld [vmem:[%s1053_s5 + $0x64] ss:$8 sps:$4 sm:$0xff]  }
   0xd   :  { %528 = vmatprep.subr.bf16.mxu1 %v720_v46  ;;  %v725_v49 = vld [vmem:[%s1053_s5 + $0x60] ss:$8 sps:$4 sm:$0xff]   ;;  %v726_v50 = vld [vmem:[%s1053_s5 + $0x54] ss:$8 sps:$4 sm:$0xff]   ;;  %v728_v51 = vld [vmem:[%s1053_s5 + $0x50] ss:$8 sps:$4 sm:$0xff]  }
   0xe   :  { %529 = vmatpush1.bf16.msra.mxu1 %v722_v47  ;;  %v729_v52 = vld [vmem:[%s1053_s5 + $0x44] ss:$8 sps:$4 sm:$0xff]   ;;  %v731_v53 = vld [vmem:[%s1053_s5 + $0x40] ss:$8 sps:$4 sm:$0xff]   ;;  %v732_v54 = vld [vmem:[%s1053_s5 + $0x34] ss:$8 sps:$4 sm:$0xff]  }
   0xf   :  { %245 = vmatpush1.bf16.msra.mxu0 %v681_v7  ;;  %530 = vmatprep.subr.bf16.mxu1 %v723_v48  ;;  %v734_v55 = vld [vmem:[%s1053_s5 + $0x30] ss:$8 sps:$4 sm:$0xff]   ;;  %v735_v56 = vld [vmem:[%s1053_s5 + $0x24] ss:$8 sps:$4 sm:$0xff]   ;;  %v737_v57 = vld [vmem:[%s1053_s5 + $0x20] ss:$8 sps:$4 sm:$0xff]  }
  0x10   :  { %246 = vmatprep.subr.bf16.mxu0 %v682_v8  ;;  %v738_v58 = vld [vmem:[%s1053_s5 + $0x14] ss:$8 sps:$4 sm:$0xff]   ;;  %v740_v59 = vld [vmem:[%s1053_s5 + $0x10] ss:$8 sps:$4 sm:$0xff]   ;;  %v741_v60 = vld [vmem:[%s1053_s5 + $0x4] ss:$8 sps:$4 sm:$0xff]  }
  0x11   :  { %v743_v61 = vld [vmem:[%s1053_s5] ss:$8 sps:$4 sm:$0xff]   ;;  %v744_v62 = vld [vmem:[%s1053_s5 + $0xf4] ss:$8 sps:$4 sm:$0xff]   ;;  %v746_v63 = vld [vmem:[%s1053_s5 + $0xf0] ss:$8 sps:$4 sm:$0xff]  }
  0x12   :  { %531 = vmatpush1.bf16.msra.mxu1 %v725_v49  ;;  %v747_v0 = vld [vmem:[%s1053_s5 + $0xe4] ss:$8 sps:$4 sm:$0xff]   ;;  %v749_v1 = vld [vmem:[%s1053_s5 + $0xe0] ss:$8 sps:$4 sm:$0xff]   ;;  %v750_v2 = vld [vmem:[%s1053_s5 + $0xd4] ss:$8 sps:$4 sm:$0xff]  }
  0x13   :  { %247 = vmatpush1.bf16.msra.mxu0 %v684_v9  ;;  %532 = vmatprep.subr.bf16.mxu1 %v726_v50  ;;  %v752_v3 = vld [vmem:[%s1053_s5 + $0xd0] ss:$8 sps:$4 sm:$0xff]   ;;  %v753_v4 = vld [vmem:[%s1053_s5 + $0xc4] ss:$8 sps:$4 sm:$0xff]   ;;  %v755_v7 = vld [vmem:[%s1053_s5 + $0xc0] ss:$8 sps:$4 sm:$0xff]  }
  0x14   :  { %248 = vmatprep.subr.bf16.mxu0 %v685_v10  ;;  %v756_v8 = vld [vmem:[%s1053_s5 + $0xb4] ss:$8 sps:$4 sm:$0xff]   ;;  %v571_v48 = vld [vmem:[%s1057_s7] sm:$0x3] }
  0x16   :  { %533 = vmatpush1.bf16.msra.mxu1 %v728_v51 }
  0x17   :  { %249 = vmatpush1.bf16.msra.mxu0 %v687_v11  ;;  %534 = vmatprep.subr.bf16.mxu1 %v729_v52 }
  0x18   :  { %250 = vmatprep.subr.bf16.mxu0 %v688_v12 }
  0x1a   :  { %535 = vmatpush1.bf16.msra.mxu1 %v731_v53 }
  0x1b   :  { %251 = vmatpush1.bf16.msra.mxu0 %v690_v15  ;;  %536 = vmatprep.subr.bf16.mxu1 %v732_v54  ;;  %v758_v15 = vld [vmem:[%s1053_s5 + $0xb0] ss:$8 sps:$4 sm:$0xff]  }
  0x1c   :  { %252 = vmatprep.subr.bf16.mxu0 %v691_v16 }
  0x1e   :  { %537 = vmatpush1.bf16.msra.mxu1 %v734_v55 }
  0x1f   :  { %253 = vmatpush1.bf16.msra.mxu0 %v693_v17  ;;  %538 = vmatprep.subr.bf16.mxu1 %v735_v56 }
  0x20   :  { %254 = vmatprep.subr.bf16.mxu0 %v694_v18  ;;  %v759_v18 = vld [vmem:[%s1053_s5 + $0xa4] ss:$8 sps:$4 sm:$0xff]  }
  0x22   :  { %539 = vmatpush1.bf16.msra.mxu1 %v737_v57 }
  0x23   :  { %255 = vmatpush2.bf16.msra.mxu0 %v696_v19  ;;  %540 = vmatprep.subr.bf16.mxu1 %v738_v58 }
  0x24   :  { %256 = vmatprep.subr.bf16.mxu0 %v697_v20 }
  0x26   :  { %541 = vmatpush1.bf16.msra.mxu1 %v740_v59 }
  0x27   :  { %257 = vmatpush2.bf16.msra.mxu0 %v699_v21  ;;  %542 = vmatprep.subr.bf16.mxu1 %v741_v60  ;;  %v761_v21 = vld [vmem:[%s1053_s5 + $0xa0] ss:$8 sps:$4 sm:$0xff]  }
  0x28   :  { %258 = vmatprep.subr.bf16.mxu0 %v700_v22 }
  0x2a   :  { %543 = vmatpush1.bf16.msra.mxu1 %v743_v61  ;;  %v589_v61 = vstv %s1058_s8 }
  0x2b   :  { %259 = vmatpush2.bf16.msra.mxu0 %v702_v23  ;;  %544 = vmatprep.subr.bf16.mxu1 %v744_v62  ;;  %v762_v23 = vld [vmem:[%s1053_s5 + $0x94] ss:$8 sps:$4 sm:$0xff]  }
  0x2c   :  { %260 = vmatprep.subr.bf16.mxu0 %v703_v24  ;;  %v764_v24 = vld [vmem:[%s1053_s5 + $0x90] ss:$8 sps:$4 sm:$0xff]  }
  0x2e   :  { %545 = vmatpush2.bf16.msra.mxu1 %v746_v63 }
  0x2f   :  { %261 = vmatpush2.bf16.msra.mxu0 %v705_v25  ;;  %546 = vmatprep.subr.bf16.mxu1 %v747_v0  ;;  %v765_v25 = vld [vmem:[%s1053_s5 + $0x84] ss:$8 sps:$4 sm:$0xff]  }
  0x30   :  { %262 = vmatprep.subr.bf16.mxu0 %v706_v26 }
  0x32   :  { %547 = vmatpush2.bf16.msra.mxu1 %v749_v1 }
  0x33   :  { %263 = vmatpush2.bf16.msra.mxu0 %v708_v27  ;;  %548 = vmatprep.subr.bf16.mxu1 %v750_v2  ;;  %v767_v27 = vld [vmem:[%s1053_s5 + $0x80] ss:$8 sps:$4 sm:$0xff]  }
  0x34   :  { %264 = vmatprep.subr.bf16.mxu0 %v709_v28 }
  0x36   :  { %549 = vmatpush2.bf16.msra.mxu1 %v752_v3 }
  0x37   :  { %265 = vmatpush2.bf16.msra.mxu0 %v711_v29  ;;  %550 = vmatprep.subr.bf16.mxu1 %v753_v4 }
  0x38   :  { %266 = vmatprep.subr.bf16.mxu0 %v712_v30 }
  0x3a   :  { %551 = vmatpush2.bf16.msra.mxu1 %v755_v7 }
  0x3b   :  { %267 = vmatpush2.bf16.msra.mxu0 %v714_v31  ;;  %552 = vmatprep.subr.bf16.mxu1 %v756_v8 }
  0x3c   :  { %268 = vmatprep.subr.bf16.mxu0 %v715_v32 }
  0x3e   :  { %553 = vmatpush2.bf16.msra.mxu1 %v758_v15 }
  0x3f   :  { %269 = vmatpush2.bf16.msra.mxu0 %v717_v33  ;;  %554 = vmatprep.subr.bf16.mxu1 %v759_v18 }
  0x42   :  { %271 = vmatmul.mubr.bf16.vlgmr.msra.gmra.mxu0 %v598_v34  ;;  %555 = vmatpush2.bf16.msra.mxu1 %v761_v21 }
  0x43   :  { %556 = vmatprep.subr.bf16.mxu1 %v762_v23 }
  0x46   :  { %557 = vmatpush2.bf16.msra.mxu1 %v764_v24 }
  0x47   :  { %558 = vmatprep.subr.bf16.mxu1 %v765_v25 }
  0x4a   :  { %559 = vmatpush2.bf16.msra.mxu1 %v767_v27 }
 0x102   :  { %v272_v36 = vpop.f32.mrf.mxu0 }
 0x103   :  { %v924_v38 = vadd.f32 %v272_v36, %v70_v35 }
 0x104   :  { %v274_v37 = vpop.f32.mrf.mxu0 }
 0x105   :  { %v926_v39 = vadd.f32 %v274_v37, %v70_v35  ;;  %v289_v44 = vmul.f32 %v924_v38, %v924_v38 }
 0x106   :  { %v276_v40 = vpop.f32.mrf.mxu0 }
 0x107   :  { %v279_v41 = vadd.f32 %v926_v39, %v924_v38  ;;  %v290_v42 = vmul.f32 %v926_v39, %v926_v39 }
 0x108   :  { %v277_v43 = vpop.f32.mrf.mxu0 }
 0x109   :  { %280 = vadd.xlane.f32.xlu0 %v279_v41  ;;  %v291_v45 = vadd.f32 %v290_v42, %v289_v44  ;;  %v358_v42 = vlaneseq }
 0x10b   :  { %v359_v43 = vshrl.u32 %v358_v42, 7 }
 0x10d   :  { %292 = vadd.xlane.f32.xlu0 %v291_v45  ;;  %v360_v44 = vsub.s32 0, %v359_v43  ;;  %v356_v45 = vld [vmem:[%s1056_s6] sm:$0x3]  ;;  %v364_v46 = vsub.s32 1, %v359_v43 }
 0x10f   :  { %v365_v47 = vrot.slane %v356_v45, %v364_v46  ;;  %v576_v53 = vrot.slane %v571_v48, %v360_v44  ;;  %v580_v54 = vrot.slane %v571_v48, %v364_v46 }
 0x192   :  { %v281_v5 = vpop.xlane.xlu0 %280 }
 0x193   :  { %v282_v6 = vrot.slane %v281_v5, 4 }
 0x195   :  { %v283_v9 = vadd.f32 %v282_v6, %v281_v5 }
 0x196   :  { %v293_v10 = vpop.xlane.xlu0 %292 }
 0x197   :  { %v284_v11 = vrot.slane %v283_v9, 2  ;;  %v294_v12 = vrot.slane %v293_v10, 4 }
 0x199   :  { %v295_v13 = vadd.f32 %v294_v12, %v293_v10  ;;  %v285_v14 = vadd.f32 %v284_v11, %v283_v9 }
 0x19b   :  { %v296_v16 = vrot.slane %v295_v13, 2  ;;  %v286_v17 = vrot.slane %v285_v14, 1 }
 0x19d   :  { %v297_v19 = vadd.f32 %v296_v16, %v295_v13  ;;  %v287_v20 = vadd.f32 %v286_v17, %v285_v14 }
 0x19f   :  { %664 = vpush %v287_v20  ;;  %v298_v22 = vrot.slane %v297_v19, 1 }
 0x1a1   :  { %v299_v26 = vadd.f32 %v298_v22, %v297_v19 }
 0x1a3   :  { %666 = vpush %v299_v26 }
 0x1d0   :  { %s665_s25 = spop %664 }
 0x1d1   :  { %s301_s26 = smul.f32 0.00048828125, %s665_s25 }
 0x1d3   :  { %s303_s27 = smul.f32 %s301_s26, %s301_s26 }
 0x1d4   :  { %s667_s28 = spop %666 }
 0x1d5   :  { %s302_s29 = smul.f32 0.00048828125, %s667_s28 }
 0x1d7   :  { %s304_s30 = ssub.f32 %s302_s29, %s303_s27 }
 0x1d9   :  { %s306_s10 = sadd.f32 1e-05, %s304_s30 }
 0x1db   :  { %v307_v28 = vstv %s306_s10 }
 0x1dc   :  { %768 = vrsqrt.f32 %v307_v28 }
 0x1e9   :  { %v769_v29 = vpop.eup %768 }
 0x1ea   :  { %668 = vpush %v769_v29 }
 0x21b   :  { %s669_s11 = spop %668 }
 0x21c   :  { %s310_s12 = smul.f32 %s669_s11, %s1054_s3 }
 0x21e   :  { %s312_s13 = smul.f32 %s310_s12, %s301_s26  ;;  %v314_v30 = vstv %s310_s12 }
 0x21f   :  { %v315_v31 = vmul.f32 %v314_v30, %v924_v38  ;;  %v316_v32 = vmul.f32 %v314_v30, %v926_v39  ;;  %v361_v38 = vrot.slane %v356_v45, %v360_v44 }
 0x220   :  { %s313_s15 = ssub.f32 %s1055_s4, %s312_s13 }
 0x222   :  { %v317_v33 = vstv %s313_s15 }
 0x223   :  { %v318_v34 = vadd.f32 %v317_v33, %v315_v31  ;;  %v319_v35 = vadd.f32 %v317_v33, %v316_v32 }
 0x225   :  { %v320_v36 = vmax.f32 %v318_v34, 0.0  ;;  %v321_v37 = vmax.f32 %v319_v35, 0.0 }
 0x227   :  { %v323_v40 = vpack.c.bf16 %v321_v37, %v321_v37  ;;  %v322_v41 = vpack.c.bf16 %v320_v36, %v320_v36 }
 0x229   :  { %560 = vmatprep.mubr.bf16.mxu1 %v323_v40 }
 0x22a   :  { %561 = vmatmul.mubr.bf16.vlgmr.msra.gmra.mxu1 %v322_v41 }
 0x2ea   :  { %v562_v39 = vpop.f32.mrf.mxu1 }
 0x2eb   :  { %v563_v49 = vadd.f32 %v562_v39, %v361_v38 }
 0x2ec   :  { %v564_v50 = vpop.f32.mrf.mxu1 }
 0x2ed   :  { %v569_v51 = vmax.f32 %v563_v49, 0.0  ;;  %v565_v52 = vadd.f32 %v564_v50, %v365_v47 }
 0x2ee   :  { %v566_v55 = vpop.f32.mrf.mxu1 }
 0x2ef   :  { %v570_v56 = vmax.f32 %v565_v52, 0.0  ;;  %v583_v58 = vmul.f32 %v576_v53, %v569_v51 }
 0x2f0   :  { %v567_v57 = vpop.f32.mrf.mxu1 }
 0x2f1   :  { %v584_v59 = vmul.f32 %v580_v54, %v570_v56 }
 0x2f3   :  { %v585_v60 = vadd.f32 %v584_v59, %v583_v58 }
 0x2f5   :  { %586 = vadd.xlane.f32.xlu1 %v585_v60 }
 0x37e   :  { %v587_v62 = vpop.xlane.xlu1 %586 }
 0x37f   :  { %v590_v63 = vadd.f32 %v589_v61, %v587_v62 }
 0x381   :  { %770 = vtanh.f32 %v590_v63 }
 0x38e   :  { %v771_v0 = vpop.eup %770 }
 0x38f   :  { %593 = vst.msk [vmem:[%s1059_s9] sm:$0xff] %vm592_vm0, %v771_v0 }

</bundles_post_ra>
